<compile_context>
chip_gen: v5e
topology: v5e:2x2
jax: 0.10.0
libtpu: 0.0.40
codegen_flags: <defaults>
</compile_context>

<pallas_src>
import jax
import jax.numpy as jnp
from jax.experimental import pallas as pl
from jax.experimental.pallas import tpu as pltpu


def _round_up(x, m):
    return ((x + m - 1) // m) * m


def _projector_kernel(x_ref, w_ref, b_ref, o_ref):
    """One (tm, N_pad) output stripe: single-shot matmul over the full K axis."""
    acc = jnp.dot(x_ref[...], w_ref[...], preferred_element_type=jnp.float32)
    o_ref[...] = (acc + b_ref[...]).astype(o_ref.dtype)


def prepare_projector_params(weight, bias, *, compute_dtype=jnp.bfloat16):
    """One-time (model-load) weight prep: transpose, cast, lane-align N.

    weight: (N, K)  -- nn.Linear weight layout
    bias:   (N,)
    Returns (weight_t, bias2d, n_out): weight_t (K, N_pad) in compute dtype,
    bias2d (1, N_pad) f32, N_pad a multiple of 128, n_out the original N.
    """
    N, K = weight.shape
    N_pad = _round_up(N, 128)
    w_t = jnp.asarray(weight).T.astype(compute_dtype)           # (K, N)
    b2d = jnp.asarray(bias).reshape(1, N).astype(jnp.float32)   # (1, N)
    if N_pad != N:
        w_t = jnp.pad(w_t, ((0, 0), (0, N_pad - N)))
        b2d = jnp.pad(b2d, ((0, 0), (0, N_pad - N)))
    return w_t, b2d, N


def _pick_tm(M, tm_max):
    """16-aligned M tile; prefer a divisor of M (>=128) so padding is a no-op."""
    tm_max = min(tm_max, _round_up(M, 16))
    tm_max = max(16, tm_max - (tm_max % 16))
    if M % tm_max == 0:
        return tm_max
    for cand in range(tm_max, 127, -16):
        if M % cand == 0:
            return cand
    return tm_max


def multimodal_projector(
    image_features,
    weight_t,
    bias2d,
    *,
    n_out=None,
    tm=512,
    compute_dtype=jnp.bfloat16,
    out_dtype=None,
):
    """y = image_features @ W^T + b

    image_features: (B, S, K)
    weight_t:       (K, N_pad)  from prepare_projector_params
    bias2d:         (1, N_pad)  f32, from prepare_projector_params
    """
    B, S, K = image_features.shape
    Kw, N_pad = weight_t.shape
    assert K == Kw, (K, Kw)
    assert N_pad % 128 == 0, N_pad
    if n_out is None:
        n_out = N_pad
    if out_dtype is None:
        out_dtype = image_features.dtype

    M = B * S
    x2d = image_features.reshape(M, K).astype(compute_dtype)

    tm = _pick_tm(M, tm)

    x_it = jnp.dtype(compute_dtype).itemsize
    w_it = jnp.dtype(weight_t.dtype).itemsize
    o_it = jnp.dtype(out_dtype).itemsize

    def vmem_bytes(tm_):
        # x / out double-buffered stripes; W + bias counted x2 conservatively
        # (constant block index -> fetched once, but buffers still allocated).
        return (
            2 * tm_ * K * x_it
            + 2 * K * N_pad * w_it
            + 2 * 8 * N_pad * 4
            + 2 * tm_ * N_pad * o_it
        )

    VMEM_CAP = 56 * 1024 * 1024  # headroom under v7x's 64 MiB physical VMEM
    while tm > 128 and vmem_bytes(tm) > VMEM_CAP:
        tm = max(128, (tm // 2) - ((tm // 2) % 16))

    M_pad = _round_up(M, tm)

    # Single-tile grid: split M only when tm >= 512 so both v7x TensorCores get
    # a full-height (>=256 row) MXU tile; harmless on 1-TC chips.
    if M_pad // tm == 1 and tm >= 512 and tm % 32 == 0:
        tm //= 2
        M_pad = _round_up(M, tm)

    if M_pad != M:
        x2d = jnp.pad(x2d, ((0, M_pad - M), (0, 0)))

    grid = (M_pad // tm,)

    cost = pl.CostEstimate(
        flops=2 * M_pad * K * N_pad,
        transcendentals=0,
        bytes_accessed=(
            M_pad * K * x_it + K * N_pad * w_it + N_pad * 4 + M_pad * N_pad * o_it
        ),
    )

    vmem_limit = min(
        64 * 1024 * 1024, max(32 * 1024 * 1024, int(vmem_bytes(tm) * 1.25))
    )

    out2d = pl.pallas_call(
        _projector_kernel,
        out_shape=jax.ShapeDtypeStruct((M_pad, N_pad), out_dtype),
        grid_spec=pl.GridSpec(
            grid=grid,
            in_specs=[
                pl.BlockSpec((tm, K), lambda i: (i, 0)),     # x row stripe, full K
                pl.BlockSpec((K, N_pad), lambda i: (0, 0)),  # W resident (one DMA)
                pl.BlockSpec((1, N_pad), lambda i: (0, 0)),  # bias resident
            ],
            out_specs=pl.BlockSpec((tm, N_pad), lambda i: (i, 0)),
        ),
        compiler_params=pltpu.CompilerParams(
            dimension_semantics=("parallel",),
            vmem_limit_bytes=vmem_limit,
        ),
        cost_estimate=cost,
    )(x2d, weight_t, bias2d)

    if M_pad != M or n_out != N_pad:
        out2d = out2d[:M, :n_out]
    return out2d.reshape(B, S, n_out)


if __name__ == "__main__":
    # Small synthetic config: vision_config.hidden_size = 256, projection_dim = 256
    batch, seq = 2, 64
    vision_hidden = 256
    projection_dim = 256

    key = jax.random.PRNGKey(0)
    k_x, k_w, k_b = jax.random.split(key, 3)

    image_features = jax.random.normal(
        k_x, (batch, seq, vision_hidden), dtype=jnp.float32
    ).astype(jnp.bfloat16)
    # nn.Linear(vision_hidden, projection_dim): weight (N, K), bias (N,)
    weight = (
        jax.random.normal(k_w, (projection_dim, vision_hidden), dtype=jnp.float32)
        * 0.02
    ).astype(jnp.bfloat16)
    bias = (
        jax.random.normal(k_b, (projection_dim,), dtype=jnp.float32) * 0.01
    ).astype(jnp.float32)

    # Hoisted, one-time weight preparation (model-load time).
    weight_t, bias2d, n_out = prepare_projector_params(weight, bias)
    weight_t, bias2d = jax.block_until_ready((weight_t, bias2d))

    out = multimodal_projector(image_features, weight_t, bias2d, n_out=n_out)
    out = jax.block_until_ready(out)

    # Reference: f32 math on the same bf16 operands.
    ref = (
        image_features.astype(jnp.float32) @ weight.T.astype(jnp.float32)
        + bias.astype(jnp.float32)
    )
    assert out.shape == (batch, seq, projection_dim)
    assert jnp.allclose(out.astype(jnp.float32), ref, atol=3e-2, rtol=3e-2)

    print("KERNEL_OK")
</pallas_src>

<mosaic_0001>
module attributes {stable_mosaic.version = 11 : i64} {
  func.func @_projector_kernel(%arg0: i32, %arg1: memref<128x256xbf16, #tpu.memory_space<vmem>>, %arg2: memref<256x256xbf16, #tpu.memory_space<vmem>>, %arg3: memref<1x256xf32, #tpu.memory_space<vmem>>, %arg4: memref<128x256xbf16, #tpu.memory_space<vmem>>) attributes {dimension_semantics = [#tpu.dimension_semantics<parallel>], iteration_bounds = array<i64: 1>, scalar_prefetch = 0 : i64, scratch_operands = 0 : i64, tpu.core_type = #tpu.core_type<tc>, window_params = [{transform_indices = @transform_0, window_bounds = array<i64: 128, 256>}, {pipeline_mode = #tpu.pipeline_mode<synchronous>, transform_indices = @transform_1, window_bounds = array<i64: 256, 256>}, {pipeline_mode = #tpu.pipeline_mode<synchronous>, transform_indices = @transform_2, window_bounds = array<i64: 1, 256>}, {transform_indices = @transform_3, window_bounds = array<i64: 128, 256>}]} {
    %c0 = arith.constant 0 : index
    %c0_0 = arith.constant 0 : index
    %0 = vector.load %arg1[%c0, %c0_0] : memref<128x256xbf16, #tpu.memory_space<vmem>>, vector<128x256xbf16>
    %c0_1 = arith.constant 0 : index
    %c0_2 = arith.constant 0 : index
    %1 = vector.load %arg2[%c0_1, %c0_2] : memref<256x256xbf16, #tpu.memory_space<vmem>>, vector<256x256xbf16>
    %cst = arith.constant dense<0.000000e+00> : vector<128x256xf32>
    %2 = tpu.matmul %0, %1, %cst {dimension_numbers = #tpu.dot_dimension_numbers<[1], [0], [0], [1], [0, 0, 1, 1], [], []>} : vector<128x256xbf16>, vector<256x256xbf16>, vector<128x256xf32> -> vector<128x256xf32>
    %c0_3 = arith.constant 0 : index
    %c0_4 = arith.constant 0 : index
    %3 = vector.load %arg3[%c0_3, %c0_4] : memref<1x256xf32, #tpu.memory_space<vmem>>, vector<1x256xf32>
    %4 = vector.broadcast %3 : vector<1x256xf32> to vector<128x256xf32>
    %5 = arith.addf %2, %4 : vector<128x256xf32>
    %6 = arith.truncf %5 : vector<128x256xf32> to vector<128x256xbf16>
    %c0_5 = arith.constant 0 : index
    %c0_6 = arith.constant 0 : index
    %7 = vector.load %arg4[%c0_5, %c0_6] : memref<128x256xbf16, #tpu.memory_space<vmem>>, vector<128x256xbf16>
    tpu.vector_store %arg4[%c0_5, %c0_6], %6 {strides = array<i32>} : memref<128x256xbf16, #tpu.memory_space<vmem>>, vector<128x256xbf16>,
    return
  }
  func.func @transform_0(%arg0: i32) -> (i32, i32) {
    %c0_i32 = arith.constant 0 : i32
    %c0_i32_0 = arith.constant 0 : i32
    return %arg0, %c0_i32 : i32, i32
  }
  func.func @transform_1(%arg0: i32) -> (i32, i32) {
    %c0_i32 = arith.constant 0 : i32
    %c0_i32_0 = arith.constant 0 : i32
    %c0_i32_1 = arith.constant 0 : i32
    return %c0_i32, %c0_i32_0 : i32, i32
  }
  func.func @transform_2(%arg0: i32) -> (i32, i32) {
    %c0_i32 = arith.constant 0 : i32
    %c0_i32_0 = arith.constant 0 : i32
    %c0_i32_1 = arith.constant 0 : i32
    return %c0_i32, %c0_i32_0 : i32, i32
  }
  func.func @transform_3(%arg0: i32) -> (i32, i32) {
    %c0_i32 = arith.constant 0 : i32
    %c0_i32_0 = arith.constant 0 : i32
    return %arg0, %c0_i32 : i32, i32
  }
}

</mosaic_0001>

<bundles_post_ra>
// kernel: tpu_custom_call.1
= control target key start
LH: loop header
LB: loop body
LE: loop exit
PB: predicated region body
PF: predicated region fallthrough
CT: control target
= control target key end

     0   :  { %8 = vsyncpa [#allocation3], 0  ;;  %s1033_s0 = inlined_call_operand.hbm [shape: bf16[128,256], index: 0, kind: input, shape index: {}]   ;;  %s1034_s1 = inlined_call_operand.hbm [shape: bf16[256,256], index: 1, kind: input, shape index: {}]   ;;  %s1035_s2 = inlined_call_operand.hbm [shape: f32[1,256], index: 2, kind: input, shape index: {}]   ;;  %s1036_s3 = inlined_call_operand.hbm [shape: bf16[128,256], index: 3, kind: output, shape index: {}]  }
   0x1   :  { %9 = vsyncpa [#allocation6], 0 }
   0x2   :  { %10 = vsyncpa [#allocation4], 0  ;;  %s28_s14 = sshll.u32 %s1034_s1, 4  ;;  %s950_s15 = smov [#allocation5]   ;;  %s29_s14 = int_to_ptr.hbm [resolvable:$true] %s28_s14 }
   0x3   :  { %s30_s16 = sshll.u32 %s950_s15, 4  ;;  %s15_s19 = sshll.u32 %s1033_s0, 4  ;;  %s31_s16 = int_to_ptr.vmem [resolvable:$true] %s30_s16  ;;  %s16_s19 = int_to_ptr.hbm [resolvable:$true] %s15_s19 }
   0x4   :  { %s951_s20 = smov 128   ;;  %s952_s21 = smov 8  }
   0x5   :  { %36 = dma.hbm_to_vmem [thread:$0]  %s29_s14, 4096, %s31_s16, [#allocation6], %s951_s20, %s951_s20, %s952_s21  }
   0x6   :  { %s953_s22 = smov [#allocation2]   ;;  %s42_s1 = sshll.u32 %s1035_s2, 4  ;;  %s43_s1 = int_to_ptr.hbm [resolvable:$true] %s42_s1 }
   0x7   :  { %s17_s23 = sshll.u32 %s953_s22, 4  ;;  %s954_s0 = smov [#allocation7]   ;;  %s18_s23 = int_to_ptr.vmem [resolvable:$true] %s17_s23 }
   0x8   :  { %23 = dma.hbm_to_vmem [thread:$0]  %s16_s19, 2048, %s18_s23, [#allocation3], %s951_s20, %s951_s20, %s952_s21  }
   0x9   :  { %s44_s26 = sshll.u32 %s954_s0, 4  ;;  %s45_s26 = int_to_ptr.vmem [resolvable:$true] %s44_s26 }
   0xa   :  { %47 = dma.hbm_to_vmem [thread:$0]  %s43_s1, 32, %s45_s26, [#allocation6]  }
   0xb   :  { %944 = dma.done.wait [#allocation3], 2048  }
   0xc   :  { %945 = vsyncadd [#allocation3], 4294965248 }
   0xd   :  { %946 = dma.done.wait [#allocation6], 4128  }
   0xe   :  { %947 = vsyncadd [#allocation6], 4294963168  ;;  %v724_v0 = vld [vmem:[#allocation5 + $0x70] sm:$0xf]  ;;  %v825_v1 = vld [vmem:[#allocation5 + $0x74] sm:$0xf0] }
   0xf   :  { %v788_v2 = vld [vmem:[#allocation5 + $0xf0] sm:$0xf]  ;;  %v725_v3 = vor.u32 %v825_v1, %v724_v0  ;;  %v841_v4 = vld [vmem:[#allocation5 + $0xf4] sm:$0xf0]  ;;  %v824_v5 = vld [vmem:[#allocation5 + $0x74] sm:$0xf] }
  0x10   :  { %v726_v6 = vld [vmem:[#allocation5 + $0x78] sm:$0xf0]  ;;  %v789_v7 = vor.u32 %v841_v4, %v788_v2  ;;  %v840_v9 = vld [vmem:[#allocation5 + $0xf4] sm:$0xf]  ;;  %v716_v11 = vld [vmem:[#allocation5 + $0x60] sm:$0xf] }
  0x11   :  { %v729_v8 = vor.u32 %v824_v5, %v726_v6  ;;  %v790_v10 = vld [vmem:[#allocation5 + $0xf8] sm:$0xf0]  ;;  %354 = vmatpush.bf16.msra.mxu0 %v725_v3  ;;  %v823_v13 = vld [vmem:[#allocation5 + $0x64] sm:$0xf0]  ;;  %v780_v14 = vld [vmem:[#allocation5 + $0xe0] sm:$0xf] }
  0x12   :  { %v793_v12 = vor.u32 %v840_v9, %v790_v10  ;;  %v839_v15 = vld [vmem:[#allocation5 + $0xe4] sm:$0xf0]  ;;  %403 = vmatpush.bf16.msra.mxu1 %v789_v7  ;;  %v717_v16 = vor.u32 %v823_v13, %v716_v11  ;;  %v822_v18 = vld [vmem:[#allocation5 + $0x64] sm:$0xf]  ;;  %v718_v19 = vld [vmem:[#allocation5 + $0x68] sm:$0xf0] }
  0x13   :  { %452 = vmatpush.bf16.msra.mxu2 %v729_v8  ;;  %v781_v17 = vor.u32 %v839_v15, %v780_v14  ;;  %v838_v20 = vld [vmem:[#allocation5 + $0xe4] sm:$0xf]  ;;  %v721_v21 = vor.u32 %v822_v18, %v718_v19  ;;  %v782_v22 = vld [vmem:[#allocation5 + $0xe8] sm:$0xf0]  ;;  %v708_v23 = vld [vmem:[#allocation5 + $0x50] sm:$0xf] }
  0x14   :  { %501 = vmatpush.bf16.msra.mxu3 %v793_v12  ;;  %v821_v24 = vld [vmem:[#allocation5 + $0x54] sm:$0xf0]  ;;  %v785_v25 = vor.u32 %v838_v20, %v782_v22  ;;  %v772_v26 = vld [vmem:[#allocation5 + $0xd0] sm:$0xf]  ;;  %v820_v28 = vld [vmem:[#allocation5 + $0x54] sm:$0xf] }
  0x15   :  { %v837_v27 = vld [vmem:[#allocation5 + $0xd4] sm:$0xf0]  ;;  %355 = vmatpush.bf16.msra.mxu0 %v717_v16  ;;  %v709_v29 = vor.u32 %v821_v24, %v708_v23  ;;  %v710_v30 = vld [vmem:[#allocation5 + $0x58] sm:$0xf0]  ;;  %v836_v31 = vld [vmem:[#allocation5 + $0xd4] sm:$0xf] }
  0x16   :  { %v774_v32 = vld [vmem:[#allocation5 + $0xd8] sm:$0xf0]  ;;  %404 = vmatpush.bf16.msra.mxu1 %v781_v17  ;;  %v773_v33 = vor.u32 %v837_v27, %v772_v26  ;;  %v713_v34 = vor.u32 %v820_v28, %v710_v30  ;;  %v700_v35 = vld [vmem:[#allocation5 + $0x40] sm:$0xf]  ;;  %v819_v36 = vld [vmem:[#allocation5 + $0x44] sm:$0xf0] }
  0x17   :  { %453 = vmatpush.bf16.msra.mxu2 %v721_v21  ;;  %v764_v37 = vld [vmem:[#allocation5 + $0xc0] sm:$0xf]  ;;  %v777_v38 = vor.u32 %v836_v31, %v774_v32  ;;  %v835_v39 = vld [vmem:[#allocation5 + $0xc4] sm:$0xf0]  ;;  %v818_v40 = vld [vmem:[#allocation5 + $0x44] sm:$0xf]  ;;  %v701_v44 = vor.u32 %v819_v36, %v700_v35 }
  0x18   :  { %502 = vmatpush.bf16.msra.mxu3 %v785_v25  ;;  %v702_v41 = vld [vmem:[#allocation5 + $0x48] sm:$0xf0]  ;;  %v834_v42 = vld [vmem:[#allocation5 + $0xc4] sm:$0xf]  ;;  %v765_v45 = vor.u32 %v835_v39, %v764_v37  ;;  %v692_v47 = vld [vmem:[#allocation5 + $0x30] sm:$0xf] }
  0x19   :  { %v766_v43 = vld [vmem:[#allocation5 + $0xc8] sm:$0xf0]  ;;  %356 = vmatpush.bf16.msra.mxu0 %v709_v29  ;;  %v705_v46 = vor.u32 %v818_v40, %v702_v41  ;;  %v817_v48 = vld [vmem:[#allocation5 + $0x34] sm:$0xf0]  ;;  %v756_v49 = vld [vmem:[#allocation5 + $0xb0] sm:$0xf] }
  0x1a   :  { %405 = vmatpush.bf16.msra.mxu1 %v773_v33  ;;  %v769_v50 = vor.u32 %v834_v42, %v766_v43  ;;  %v833_v51 = vld [vmem:[#allocation5 + $0xb4] sm:$0xf0]  ;;  %v816_v52 = vld [vmem:[#allocation5 + $0x34] sm:$0xf]  ;;  %v694_v53 = vld [vmem:[#allocation5 + $0x38] sm:$0xf0]  ;;  %v693_v56 = vor.u32 %v817_v48, %v692_v47 }
  0x1b   :  { %454 = vmatpush.bf16.msra.mxu2 %v713_v34  ;;  %v832_v54 = vld [vmem:[#allocation5 + $0xb4] sm:$0xf]  ;;  %v758_v55 = vld [vmem:[#allocation5 + $0xb8] sm:$0xf0]  ;;  %v757_v57 = vor.u32 %v833_v51, %v756_v49  ;;  %v697_v58 = vor.u32 %v816_v52, %v694_v53  ;;  %v684_v59 = vld [vmem:[#allocation5 + $0x20] sm:$0xf] }
  0x1c   :  { %503 = vmatpush.bf16.msra.mxu3 %v777_v38  ;;  %v815_v60 = vld [vmem:[#allocation5 + $0x24] sm:$0xf0]  ;;  %v748_v61 = vld [vmem:[#allocation5 + $0xa0] sm:$0xf]  ;;  %v761_v62 = vor.u32 %v832_v54, %v758_v55  ;;  %v814_v0 = vld [vmem:[#allocation5 + $0x24] sm:$0xf] }
  0x1d   :  { %357 = vmatpush.bf16.msra.mxu0 %v701_v44  ;;  %v831_v63 = vld [vmem:[#allocation5 + $0xa4] sm:$0xf0]  ;;  %v686_v1 = vld [vmem:[#allocation5 + $0x28] sm:$0xf0]  ;;  %v830_v2 = vld [vmem:[#allocation5 + $0xa4] sm:$0xf]  ;;  %v685_v4 = vor.u32 %v815_v60, %v684_v59 }
  0x1e   :  { %406 = vmatpush.bf16.msra.mxu1 %v765_v45  ;;  %v750_v3 = vld [vmem:[#allocation5 + $0xa8] sm:$0xf0]  ;;  %v749_v5 = vor.u32 %v831_v63, %v748_v61  ;;  %v689_v6 = vor.u32 %v814_v0, %v686_v1  ;;  %v676_v7 = vld [vmem:[#allocation5 + $0x10] sm:$0xf]  ;;  %v813_v8 = vld [vmem:[#allocation5 + $0x14] sm:$0xf0] }
  0x1f   :  { %455 = vmatpush.bf16.msra.mxu2 %v705_v46  ;;  %v740_v9 = vld [vmem:[#allocation5 + $0x90] sm:$0xf]  ;;  %v753_v10 = vor.u32 %v830_v2, %v750_v3  ;;  %v829_v11 = vld [vmem:[#allocation5 + $0x94] sm:$0xf0]  ;;  %v812_v12 = vld [vmem:[#allocation5 + $0x14] sm:$0xf]  ;;  %v677_v16 = vor.u32 %v813_v8, %v676_v7 }
  0x20   :  { %504 = vmatpush.bf16.msra.mxu3 %v769_v50  ;;  %v678_v13 = vld [vmem:[#allocation5 + $0x18] sm:$0xf0]  ;;  %v828_v14 = vld [vmem:[#allocation5 + $0x94] sm:$0xf]  ;;  %v741_v17 = vor.u32 %v829_v11, %v740_v9  ;;  %v668_v19 = vld [vmem:[#allocation5] sm:$0xf] }
  0x21   :  { %358 = vmatpush.bf16.msra.mxu0 %v693_v56  ;;  %v742_v15 = vld [vmem:[#allocation5 + $0x98] sm:$0xf0]  ;;  %v681_v18 = vor.u32 %v812_v12, %v678_v13  ;;  %v811_v20 = vld [vmem:[#allocation5 + $0x4] sm:$0xf0]  ;;  %v732_v21 = vld [vmem:[#allocation5 + $0x80] sm:$0xf] }
  0x22   :  { %407 = vmatpush.bf16.msra.mxu1 %v757_v57  ;;  %v745_v22 = vor.u32 %v828_v14, %v742_v15  ;;  %v827_v23 = vld [vmem:[#allocation5 + $0x84] sm:$0xf0]  ;;  %v810_v24 = vld [vmem:[#allocation5 + $0x4] sm:$0xf]  ;;  %v670_v25 = vld [vmem:[#allocation5 + $0x8] sm:$0xf0]  ;;  %v669_v28 = vor.u32 %v811_v20, %v668_v19 }
  0x23   :  { %456 = vmatpush.bf16.msra.mxu2 %v697_v58  ;;  %v826_v26 = vld [vmem:[#allocation5 + $0x84] sm:$0xf]  ;;  %v734_v27 = vld [vmem:[#allocation5 + $0x88] sm:$0xf0]  ;;  %v604_v29 = vld [vmem:[#allocation2] sm:$0xf]  ;;  %v733_v31 = vor.u32 %v827_v23, %v732_v21  ;;  %v673_v32 = vor.u32 %v810_v24, %v670_v25 }
  0x24   :  { %505 = vmatpush.bf16.msra.mxu3 %v761_v62  ;;  %v795_v30 = vld [vmem:[#allocation2 + $0x4] sm:$0xf0]  ;;  %v794_v33 = vld [vmem:[#allocation2 + $0x4] sm:$0xf]  ;;  %v606_v34 = vld [vmem:[#allocation2 + $0x8] sm:$0xf0]  ;;  %v737_v35 = vor.u32 %v826_v26, %v734_v27 }
  0x25   :  { %359 = vmatpush.bf16.msra.mxu0 %v685_v4  ;;  %v605_v36 = vor.u32 %v795_v30, %v604_v29  ;;  %v609_v37 = vor.u32 %v794_v33, %v606_v34  ;;  %v612_v38 = vld [vmem:[#allocation2 + $0x10] sm:$0xf]  ;;  %v797_v39 = vld [vmem:[#allocation2 + $0x14] sm:$0xf0]  ;;  %v796_v40 = vld [vmem:[#allocation2 + $0x14] sm:$0xf] }
  0x26   :  { %408 = vmatpush.bf16.msra.mxu1 %v749_v5  ;;  %v614_v41 = vld [vmem:[#allocation2 + $0x18] sm:$0xf0]  ;;  %v613_v42 = vor.u32 %v797_v39, %v612_v38  ;;  %v620_v44 = vld [vmem:[#allocation2 + $0x20] sm:$0xf]  ;;  %v799_v45 = vld [vmem:[#allocation2 + $0x24] sm:$0xf0] }
  0x27   :  { %457 = vmatpush.bf16.msra.mxu2 %v689_v6  ;;  %v617_v43 = vor.u32 %v796_v40, %v614_v41  ;;  %v798_v46 = vld [vmem:[#allocation2 + $0x24] sm:$0xf]  ;;  %v622_v47 = vld [vmem:[#allocation2 + $0x28] sm:$0xf0]  ;;  %v621_v48 = vor.u32 %v799_v45, %v620_v44  ;;  %v628_v50 = vld [vmem:[#allocation2 + $0x30] sm:$0xf] }
  0x28   :  { %506 = vmatpush.bf16.msra.mxu3 %v753_v10  ;;  %v625_v49 = vor.u32 %v798_v46, %v622_v47  ;;  %v801_v51 = vld [vmem:[#allocation2 + $0x34] sm:$0xf0]  ;;  %v800_v52 = vld [vmem:[#allocation2 + $0x34] sm:$0xf]  ;;  %v630_v53 = vld [vmem:[#allocation2 + $0x38] sm:$0xf0] }
  0x29   :  { %360 = vmatpush.bf16.msra.mxu0 %v677_v16  ;;  %v629_v54 = vor.u32 %v801_v51, %v628_v50  ;;  %v633_v55 = vor.u32 %v800_v52, %v630_v53  ;;  %v636_v56 = vld [vmem:[#allocation2 + $0x40] sm:$0xf]  ;;  %v803_v57 = vld [vmem:[#allocation2 + $0x44] sm:$0xf0]  ;;  %v802_v58 = vld [vmem:[#allocation2 + $0x44] sm:$0xf] }
  0x2a   :  { %409 = vmatpush.bf16.msra.mxu1 %v741_v17  ;;  %v638_v59 = vld [vmem:[#allocation2 + $0x48] sm:$0xf0]  ;;  %v637_v60 = vor.u32 %v803_v57, %v636_v56  ;;  %v644_v62 = vld [vmem:[#allocation2 + $0x50] sm:$0xf]  ;;  %v805_v63 = vld [vmem:[#allocation2 + $0x54] sm:$0xf0] }
  0x2b   :  { %458 = vmatpush.bf16.msra.mxu2 %v681_v18  ;;  %v641_v61 = vor.u32 %v802_v58, %v638_v59  ;;  %v804_v0 = vld [vmem:[#allocation2 + $0x54] sm:$0xf]  ;;  %v646_v1 = vld [vmem:[#allocation2 + $0x58] sm:$0xf0]  ;;  %v645_v2 = vor.u32 %v805_v63, %v644_v62  ;;  %v652_v4 = vld [vmem:[#allocation2 + $0x60] sm:$0xf] }
  0x2c   :  { %507 = vmatpush.bf16.msra.mxu3 %v745_v22  ;;  %v649_v3 = vor.u32 %v804_v0, %v646_v1  ;;  %v807_v5 = vld [vmem:[#allocation2 + $0x64] sm:$0xf0]  ;;  %v806_v6 = vld [vmem:[#allocation2 + $0x64] sm:$0xf]  ;;  %v654_v7 = vld [vmem:[#allocation2 + $0x68] sm:$0xf0] }
  0x2d   :  { %361 = vmatpush.bf16.msra.mxu0 %v669_v28  ;;  %v653_v8 = vor.u32 %v807_v5, %v652_v4  ;;  %v657_v9 = vor.u32 %v806_v6, %v654_v7  ;;  %v660_v10 = vld [vmem:[#allocation2 + $0x70] sm:$0xf]  ;;  %v809_v11 = vld [vmem:[#allocation2 + $0x74] sm:$0xf0]  ;;  %v808_v12 = vld [vmem:[#allocation2 + $0x74] sm:$0xf] }
  0x2e   :  { %410 = vmatpush.bf16.msra.mxu1 %v733_v31  ;;  %v662_v13 = vld [vmem:[#allocation2 + $0x78] sm:$0xf0]  ;;  %v661_v14 = vor.u32 %v809_v11, %v660_v10  ;;  %v108_v16 = vld [vmem:[#allocation7] sm:$0x3]  ;;  %s955_s2 = smov [#allocation8]   ;;  %s588_s30 = sshll.u32 %s1036_s3, 4  ;;  %s589_s30 = int_to_ptr.hbm [resolvable:$true] %s588_s30 }
  0x2f   :  { %459 = vmatpush.bf16.msra.mxu2 %v673_v32  ;;  %v665_v15 = vor.u32 %v808_v12, %v662_v13  ;;  %v991_v17 = vperm.slane %v108_v16, 0  ;;  %v994_v21 = vperm.slane %v108_v16, 1  ;;  %s586_s27 = sshll.u32 %s955_s2, 4  ;;  %s587_s27 = int_to_ptr.vmem [resolvable:$true] %s586_s27 }
  0x30   :  { %508 = vmatpush.bf16.msra.mxu3 %v737_v35  ;;  %362 = vmatmul.bf16.vlgmr.msra.gmra.mxu0 %v605_v36 }
  0x31   :  { %411 = vmatmul.bf16.vlgmr.msra.gmra.mxu1 %v609_v37 }
  0x32   :  { %460 = vmatmul.bf16.vlgmr.msra.gmra.mxu2 %v605_v36 }
  0x33   :  { %509 = vmatmul.bf16.vlgmr.msra.gmra.mxu3 %v609_v37 }
  0x40   :  { %367 = vmatmul.bf16.gmra.mxu0 %v613_v42 }
  0x41   :  { %416 = vmatmul.bf16.gmra.mxu1 %v617_v43 }
  0x42   :  { %465 = vmatmul.bf16.gmra.mxu2 %v613_v42 }
  0x43   :  { %514 = vmatmul.bf16.gmra.mxu3 %v617_v43 }
  0x50   :  { %372 = vmatmul.bf16.gmra.mxu0 %v621_v48 }
  0x51   :  { %421 = vmatmul.bf16.gmra.mxu1 %v625_v49 }
  0x52   :  { %470 = vmatmul.bf16.gmra.mxu2 %v621_v48 }
  0x53   :  { %519 = vmatmul.bf16.gmra.mxu3 %v625_v49 }
  0x60   :  { %377 = vmatmul.bf16.gmra.mxu0 %v629_v54 }
  0x61   :  { %426 = vmatmul.bf16.gmra.mxu1 %v633_v55 }
  0x62   :  { %475 = vmatmul.bf16.gmra.mxu2 %v629_v54 }
  0x63   :  { %524 = vmatmul.bf16.gmra.mxu3 %v633_v55 }
  0x70   :  { %382 = vmatmul.bf16.gmra.mxu0 %v637_v60 }
  0x71   :  { %431 = vmatmul.bf16.gmra.mxu1 %v641_v61 }
  0x72   :  { %480 = vmatmul.bf16.gmra.mxu2 %v637_v60 }
  0x73   :  { %529 = vmatmul.bf16.gmra.mxu3 %v641_v61 }
  0x80   :  { %387 = vmatmul.bf16.gmra.mxu0 %v645_v2 }
  0x81   :  { %436 = vmatmul.bf16.gmra.mxu1 %v649_v3 }
  0x82   :  { %485 = vmatmul.bf16.gmra.mxu2 %v645_v2 }
  0x83   :  { %534 = vmatmul.bf16.gmra.mxu3 %v649_v3 }
  0x90   :  { %392 = vmatmul.bf16.gmra.mxu0 %v653_v8 }
  0x91   :  { %441 = vmatmul.bf16.gmra.mxu1 %v657_v9 }
  0x92   :  { %490 = vmatmul.bf16.gmra.mxu2 %v653_v8 }
  0x93   :  { %539 = vmatmul.bf16.gmra.mxu3 %v657_v9 }
  0xa0   :  { %397 = vmatmul.bf16.gmra.mxu0 %v661_v14 }
  0xa1   :  { %446 = vmatmul.bf16.gmra.mxu1 %v665_v15 }
  0xa2   :  { %495 = vmatmul.bf16.gmra.mxu2 %v661_v14 }
  0xa3   :  { %544 = vmatmul.bf16.gmra.mxu3 %v665_v15 }
  0xad   :  { %v363_v18 = vpop.f32.mrf.mxu0 }
  0xae   :  { %v412_v19 = vpop.f32.mrf.mxu1  ;;  %v364_v20 = vadd.f32 %v363_v18, %v991_v17 }
  0xb0   :  { %v413_v23 = vadd.f32 %v412_v19, %v364_v20 }
  0xb5   :  { %v461_v22 = vpop.f32.mrf.mxu2  ;;  %v365_v26 = vpop.f32.mrf.mxu0 }
  0xb6   :  { %v462_v24 = vadd.f32 %v461_v22, %v994_v21  ;;  %v510_v25 = vpop.f32.mrf.mxu3  ;;  %v414_v27 = vpop.f32.mrf.mxu1  ;;  %v366_v30 = vadd.f32 %v365_v26, %v991_v17 }
  0xb8   :  { %v511_v28 = vadd.f32 %v510_v25, %v462_v24  ;;  %v415_v36 = vadd.f32 %v414_v27, %v366_v30 }
  0xba   :  { %v550_v29 = vpack.c.bf16 %v511_v28, %v413_v23 }
  0xbc   :  { %566 = vst [vmem:[#allocation8] sm:$0xff] %v550_v29 }
  0xbd   :  { %v463_v31 = vpop.f32.mrf.mxu2  ;;  %v368_v34 = vpop.f32.mrf.mxu0 }
  0xbe   :  { %v464_v32 = vadd.f32 %v463_v31, %v994_v21  ;;  %v512_v33 = vpop.f32.mrf.mxu3  ;;  %v417_v35 = vpop.f32.mrf.mxu1  ;;  %v369_v39 = vadd.f32 %v368_v34, %v991_v17 }
  0xc0   :  { %v513_v37 = vadd.f32 %v512_v33, %v464_v32  ;;  %v418_v41 = vadd.f32 %v417_v35, %v369_v39 }
  0xc2   :  { %v551_v38 = vpack.c.bf16 %v513_v37, %v415_v36 }
  0xc4   :  { %567 = vst [vmem:[#allocation8 + $0x8] sm:$0xff] %v551_v38 }
  0xc5   :  { %v466_v40 = vpop.f32.mrf.mxu2  ;;  %v370_v44 = vpop.f32.mrf.mxu0 }
  0xc6   :  { %v467_v42 = vadd.f32 %v466_v40, %v994_v21  ;;  %v515_v43 = vpop.f32.mrf.mxu3  ;;  %v419_v45 = vpop.f32.mrf.mxu1  ;;  %v371_v48 = vadd.f32 %v370_v44, %v991_v17 }
  0xc8   :  { %v516_v46 = vadd.f32 %v515_v43, %v467_v42  ;;  %v420_v54 = vadd.f32 %v419_v45, %v371_v48 }
  0xca   :  { %v552_v47 = vpack.c.bf16 %v516_v46, %v418_v41 }
  0xcc   :  { %568 = vst [vmem:[#allocation8 + $0x10] sm:$0xff] %v552_v47 }
  0xcd   :  { %v468_v49 = vpop.f32.mrf.mxu2  ;;  %v373_v52 = vpop.f32.mrf.mxu0 }
  0xce   :  { %v469_v50 = vadd.f32 %v468_v49, %v994_v21  ;;  %v517_v51 = vpop.f32.mrf.mxu3  ;;  %v422_v53 = vpop.f32.mrf.mxu1  ;;  %v374_v57 = vadd.f32 %v373_v52, %v991_v17 }
  0xd0   :  { %v518_v55 = vadd.f32 %v517_v51, %v469_v50  ;;  %v423_v59 = vadd.f32 %v422_v53, %v374_v57 }
  0xd2   :  { %v553_v56 = vpack.c.bf16 %v518_v55, %v420_v54 }
  0xd4   :  { %569 = vst [vmem:[#allocation8 + $0x18] sm:$0xff] %v553_v56 }
  0xd5   :  { %v471_v58 = vpop.f32.mrf.mxu2  ;;  %v375_v62 = vpop.f32.mrf.mxu0 }
  0xd6   :  { %v472_v60 = vadd.f32 %v471_v58, %v994_v21  ;;  %v520_v61 = vpop.f32.mrf.mxu3  ;;  %v424_v63 = vpop.f32.mrf.mxu1  ;;  %v376_v2 = vadd.f32 %v375_v62, %v991_v17 }
  0xd8   :  { %v521_v0 = vadd.f32 %v520_v61, %v472_v60  ;;  %v425_v8 = vadd.f32 %v424_v63, %v376_v2 }
  0xda   :  { %v554_v1 = vpack.c.bf16 %v521_v0, %v423_v59 }
  0xdc   :  { %570 = vst [vmem:[#allocation8 + $0x20] sm:$0xff] %v554_v1 }
  0xdd   :  { %v473_v3 = vpop.f32.mrf.mxu2  ;;  %v378_v6 = vpop.f32.mrf.mxu0 }
  0xde   :  { %v474_v4 = vadd.f32 %v473_v3, %v994_v21  ;;  %v522_v5 = vpop.f32.mrf.mxu3  ;;  %v427_v7 = vpop.f32.mrf.mxu1  ;;  %v379_v11 = vadd.f32 %v378_v6, %v991_v17 }
  0xe0   :  { %v523_v9 = vadd.f32 %v522_v5, %v474_v4  ;;  %v428_v13 = vadd.f32 %v427_v7, %v379_v11 }
  0xe2   :  { %v555_v10 = vpack.c.bf16 %v523_v9, %v425_v8 }
  0xe4   :  { %571 = vst [vmem:[#allocation8 + $0x28] sm:$0xff] %v555_v10 }
  0xe5   :  { %v476_v12 = vpop.f32.mrf.mxu2  ;;  %v380_v16 = vpop.f32.mrf.mxu0 }
  0xe6   :  { %v477_v14 = vadd.f32 %v476_v12, %v994_v21  ;;  %v525_v15 = vpop.f32.mrf.mxu3  ;;  %v429_v18 = vpop.f32.mrf.mxu1  ;;  %v381_v22 = vadd.f32 %v380_v16, %v991_v17 }
  0xe8   :  { %v526_v19 = vadd.f32 %v525_v15, %v477_v14  ;;  %v430_v28 = vadd.f32 %v429_v18, %v381_v22 }
  0xea   :  { %v556_v20 = vpack.c.bf16 %v526_v19, %v428_v13 }
  0xec   :  { %572 = vst [vmem:[#allocation8 + $0x30] sm:$0xff] %v556_v20 }
  0xed   :  { %v478_v23 = vpop.f32.mrf.mxu2  ;;  %v383_v26 = vpop.f32.mrf.mxu0 }
  0xee   :  { %v479_v24 = vadd.f32 %v478_v23, %v994_v21  ;;  %v527_v25 = vpop.f32.mrf.mxu3  ;;  %v432_v27 = vpop.f32.mrf.mxu1  ;;  %v384_v31 = vadd.f32 %v383_v26, %v991_v17 }
  0xf0   :  { %v528_v29 = vadd.f32 %v527_v25, %v479_v24  ;;  %v433_v33 = vadd.f32 %v432_v27, %v384_v31 }
  0xf2   :  { %v557_v30 = vpack.c.bf16 %v528_v29, %v430_v28 }
  0xf4   :  { %573 = vst [vmem:[#allocation8 + $0x38] sm:$0xff] %v557_v30 }
  0xf5   :  { %v481_v32 = vpop.f32.mrf.mxu2  ;;  %v385_v36 = vpop.f32.mrf.mxu0 }
  0xf6   :  { %v482_v34 = vadd.f32 %v481_v32, %v994_v21  ;;  %v530_v35 = vpop.f32.mrf.mxu3  ;;  %v434_v37 = vpop.f32.mrf.mxu1  ;;  %v386_v40 = vadd.f32 %v385_v36, %v991_v17 }
  0xf8   :  { %v531_v38 = vadd.f32 %v530_v35, %v482_v34  ;;  %v435_v46 = vadd.f32 %v434_v37, %v386_v40 }
  0xfa   :  { %v558_v39 = vpack.c.bf16 %v531_v38, %v433_v33 }
  0xfc   :  { %574 = vst [vmem:[#allocation8 + $0x40] sm:$0xff] %v558_v39 }
  0xfd   :  { %v483_v41 = vpop.f32.mrf.mxu2  ;;  %v388_v44 = vpop.f32.mrf.mxu0 }
  0xfe   :  { %v484_v42 = vadd.f32 %v483_v41, %v994_v21  ;;  %v532_v43 = vpop.f32.mrf.mxu3  ;;  %v437_v45 = vpop.f32.mrf.mxu1  ;;  %v389_v49 = vadd.f32 %v388_v44, %v991_v17 }
 0x100   :  { %v533_v47 = vadd.f32 %v532_v43, %v484_v42  ;;  %v438_v51 = vadd.f32 %v437_v45, %v389_v49 }
 0x102   :  { %v559_v48 = vpack.c.bf16 %v533_v47, %v435_v46 }
 0x104   :  { %575 = vst [vmem:[#allocation8 + $0x48] sm:$0xff] %v559_v48 }
 0x105   :  { %v486_v50 = vpop.f32.mrf.mxu2  ;;  %v390_v54 = vpop.f32.mrf.mxu0 }
 0x106   :  { %v487_v52 = vadd.f32 %v486_v50, %v994_v21  ;;  %v535_v53 = vpop.f32.mrf.mxu3  ;;  %v439_v55 = vpop.f32.mrf.mxu1  ;;  %v391_v58 = vadd.f32 %v390_v54, %v991_v17 }
 0x108   :  { %v536_v56 = vadd.f32 %v535_v53, %v487_v52  ;;  %v440_v63 = vadd.f32 %v439_v55, %v391_v58 }
 0x10a   :  { %v560_v57 = vpack.c.bf16 %v536_v56, %v438_v51 }
 0x10c   :  { %576 = vst [vmem:[#allocation8 + $0x50] sm:$0xff] %v560_v57 }
 0x10d   :  { %v488_v59 = vpop.f32.mrf.mxu2  ;;  %v393_v62 = vpop.f32.mrf.mxu0 }
 0x10e   :  { %v489_v60 = vadd.f32 %v488_v59, %v994_v21  ;;  %v537_v61 = vpop.f32.mrf.mxu3  ;;  %v442_v1 = vpop.f32.mrf.mxu1  ;;  %v394_v3 = vadd.f32 %v393_v62, %v991_v17 }
 0x110   :  { %v538_v0 = vadd.f32 %v537_v61, %v489_v60  ;;  %v443_v5 = vadd.f32 %v442_v1, %v394_v3 }
 0x112   :  { %v561_v2 = vpack.c.bf16 %v538_v0, %v440_v63 }
 0x114   :  { %577 = vst [vmem:[#allocation8 + $0x58] sm:$0xff] %v561_v2 }
 0x115   :  { %v491_v4 = vpop.f32.mrf.mxu2  ;;  %v395_v8 = vpop.f32.mrf.mxu0 }
 0x116   :  { %v492_v6 = vadd.f32 %v491_v4, %v994_v21  ;;  %v540_v7 = vpop.f32.mrf.mxu3  ;;  %v444_v11 = vpop.f32.mrf.mxu1  ;;  %v396_v12 = vadd.f32 %v395_v8, %v991_v17 }
 0x118   :  { %v541_v9 = vadd.f32 %v540_v7, %v492_v6  ;;  %v445_v18 = vadd.f32 %v444_v11, %v396_v12 }
 0x11a   :  { %v562_v10 = vpack.c.bf16 %v541_v9, %v443_v5 }
 0x11c   :  { %578 = vst [vmem:[#allocation8 + $0x60] sm:$0xff] %v562_v10 }
 0x11d   :  { %v493_v13 = vpop.f32.mrf.mxu2  ;;  %v398_v16 = vpop.f32.mrf.mxu0 }
 0x11e   :  { %v494_v14 = vadd.f32 %v493_v13, %v994_v21  ;;  %v542_v15 = vpop.f32.mrf.mxu3  ;;  %v399_v22 = vadd.f32 %v398_v16, %v991_v17  ;;  %v447_v23 = vpop.f32.mrf.mxu1 }
 0x120   :  { %v543_v19 = vadd.f32 %v542_v15, %v494_v14  ;;  %v448_v25 = vadd.f32 %v447_v23, %v399_v22 }
 0x122   :  { %v563_v20 = vpack.c.bf16 %v543_v19, %v445_v18 }
 0x124   :  { %579 = vst [vmem:[#allocation8 + $0x68] sm:$0xff] %v563_v20 }
 0x125   :  { %v496_v24 = vpop.f32.mrf.mxu2  ;;  %v400_v29 = vpop.f32.mrf.mxu0 }
 0x126   :  { %v497_v26 = vadd.f32 %v496_v24, %v994_v21  ;;  %v545_v27 = vpop.f32.mrf.mxu3  ;;  %v401_v31 = vadd.f32 %v400_v29, %v991_v17  ;;  %v449_v34 = vpop.f32.mrf.mxu1 }
 0x128   :  { %v546_v28 = vadd.f32 %v545_v27, %v497_v26  ;;  %v450_v36 = vadd.f32 %v449_v34, %v401_v31 }
 0x12a   :  { %v564_v30 = vpack.c.bf16 %v546_v28, %v448_v25 }
 0x12c   :  { %580 = vst [vmem:[#allocation8 + $0x70] sm:$0xff] %v564_v30 }
 0x12d   :  { %v498_v32 = vpop.f32.mrf.mxu2 }
 0x12e   :  { %v499_v33 = vadd.f32 %v498_v32, %v994_v21  ;;  %v547_v35 = vpop.f32.mrf.mxu3 }
 0x130   :  { %v548_v37 = vadd.f32 %v547_v35, %v499_v33 }
 0x132   :  { %v565_v38 = vpack.c.bf16 %v548_v37, %v450_v36 }
 0x134   :  { %581 = vst [vmem:[#allocation8 + $0x78] sm:$0xff] %v565_v38 }
 0x135   :  { %594 = dma.vmem_to_hbm [thread:$0]  %s587_s27, 2048, %s589_s30, [#allocation4], %s951_s20, %s951_s20, %s952_s21  }
 0x136   :  { %948 = dma.done.wait [#allocation4], 2048  }
 0x137   :  { %949 = vsyncadd [#allocation4], 4294965248 }
 0x138   :  { %599 = vsyncpa [#allocation3], 1 }
 0x139   :  { %600 = vsyncpa [#allocation6], 1 }
 0x13a   :  { %601 = vsyncpa [#allocation4], 1 }

</bundles_post_ra>
